<compile_context>
chip_gen: v5e
topology: v5e:2x2
jax: 0.10.0
libtpu: 0.0.40
codegen_flags: <defaults>
</compile_context>

<pallas_src>
import functools

import jax
import jax.numpy as jnp
import numpy as np
from jax.experimental import pallas as pl
from jax.experimental.pallas import tpu as pltpu


_MAX_TILE_B = 1024  # keeps intermediates + double-buffered I/O under v5e's 16 MiB scoped VMEM


def _round_up(x, m):
    return ((x + m - 1) // m) * m


def _choose_tiling(batch):
    """Pick (tile_b, num_tiles).

    Few grid steps (per-step overhead dominates this tiny net), tiles capped at
    _MAX_TILE_B for v5e/v7x VMEM, and >=2 balanced tiles for large batches so the
    "parallel" grid axis can be sharded across v7x's two TensorCores.
    """
    b8 = _round_up(max(batch, 1), 8)
    if b8 <= _MAX_TILE_B:
        if b8 >= 512:  # big enough that a second step is worth a second core on v7x
            tile = _round_up(pl.cdiv(b8, 2), 8)
            return tile, 2
        return b8, 1
    num = pl.cdiv(b8, _MAX_TILE_B)
    if num % 2:       # keep an even tile count for v7x's 2 TensorCores
        num += 1
    tile = _round_up(pl.cdiv(b8, num), 8)
    return tile, num


def critic_kernel(state_ref, action_ref,
                  w1_ref, b1_ref,
                  w2h_ref, w2a_ref, b2_ref,
                  w3_ref, b3_ref,
                  wo_ref, bo_ref,
                  out_ref):
    # f32 activations arrive from HBM; cast to bf16 in-kernel (rides an idle VALU slot)
    # so the wrapper doesn't spend an extra HBM pass on the cast.
    x = state_ref[...].astype(jnp.bfloat16)                 # [tile_b, d_in]
    a = action_ref[...].astype(jnp.bfloat16)                # [tile_b, n_actions]

    # --- fc1 (bf16 MXU, f32 acc) + relu ---
    h1 = jnp.dot(x, w1_ref[...], preferred_element_type=jnp.float32) + b1_ref[...]
    h1 = jnp.maximum(h1, 0.0)

    # --- LayerNorm (bn1), single-pass f32 statistics; gamma/beta folded into fc2 at init ---
    inv_n = 1.0 / h1.shape[-1]
    mean = jnp.sum(h1, axis=-1, keepdims=True) * inv_n
    var = jnp.maximum(jnp.sum(h1 * h1, axis=-1, keepdims=True) * inv_n - mean * mean, 0.0)
    h1 = (h1 - mean) * jax.lax.rsqrt(var + 1e-5)

    # --- fc2 on cat([h1, action], 1) as a split matmul (no XLU concat) + relu ---
    h2 = (jnp.dot(h1.astype(jnp.bfloat16), w2h_ref[...], preferred_element_type=jnp.float32)
          + jnp.dot(a, w2a_ref[...], preferred_element_type=jnp.float32)
          + b2_ref[...])
    h2 = jnp.maximum(h2, 0.0)

    # --- fc3 + relu ---
    h3 = (jnp.dot(h2.astype(jnp.bfloat16), w3_ref[...],
                  preferred_element_type=jnp.float32) + b3_ref[...])
    h3 = jnp.maximum(h3, 0.0)

    # --- output layer (N=1): VPU multiply + lane reduction, then flip the [tile_b,1]
    #     column into a lane-dense [1, tile_b] row so the store is an unmasked vst. ---
    q = jnp.sum(h3 * wo_ref[...], axis=-1, keepdims=True) + bo_ref[...]   # [tile_b, 1] f32
    out_ref[...] = jnp.transpose(q).reshape(out_ref.shape).astype(out_ref.dtype)


def critic_forward(state, action, params):
    """Runs the critic forward, gridded over the batch dimension."""
    B, d_in = state.shape
    n_act = action.shape[1]
    f1 = params["w1"].shape[1]
    f2 = params["w2h"].shape[1]
    f3 = params["w3"].shape[1]

    tile_b, num_tiles = _choose_tiling(B)
    b_pad = tile_b * num_tiles
    if b_pad != B:
        # Padded zero rows are safe: relu(0)=0, LN with eps=1e-5 stays finite, and the
        # wrapper slices the result back to the first B rows.
        state = jnp.pad(state, ((0, b_pad - B), (0, 0)))
        action = jnp.pad(action, ((0, b_pad - B), (0, 0)))

    def resident(shape):
        nd = len(shape)
        return pl.BlockSpec(shape, lambda *_: (0,) * nd)   # constant index_map: stays in VMEM

    in_specs = [
        pl.BlockSpec((tile_b, d_in), lambda i: (i, 0)),    # state tile (f32)
        pl.BlockSpec((tile_b, n_act), lambda i: (i, 0)),   # action tile (f32)
        resident((d_in, f1)),                              # w1 (bf16)
        resident((1, f1)),                                 # b1 (f32)
        resident((f1, f2)),                                # w2 h1-part, gamma-folded (bf16)
        resident((n_act, f2)),                             # w2 action-part (bf16)
        resident((1, f2)),                                 # b2, beta-folded (f32)
        resident((f2, f3)),                                # w3 (bf16)
        resident((1, f3)),                                 # b3 (f32)
        resident((1, f3)),                                 # wo row (f32, VPU reduce)
        resident((1, 1)),                                  # bo (f32)
    ]
    # Lane-dense output: one (1, 1, tile_b) row per grid step.
    out_specs = pl.BlockSpec((1, 1, tile_b), lambda i: (i, 0, 0))

    flops = 2 * b_pad * (d_in * f1 + (f1 + n_act) * f2 + f2 * f3 + f3)
    bytes_accessed = (
        2 * (d_in * f1 + f1 * f2 + n_act * f2 + f2 * f3)   # bf16 weights
        + 4 * (f1 + f2 + 2 * f3 + 1)                       # f32 biases / wo / bo
        + 4 * b_pad * (d_in + n_act)                       # f32 activations in
        + 4 * b_pad                                        # f32 q out
    )
    cost = pl.CostEstimate(flops=int(flops), transcendentals=int(b_pad),
                           bytes_accessed=int(bytes_accessed))

    out = pl.pallas_call(
        critic_kernel,
        out_shape=jax.ShapeDtypeStruct((num_tiles, 1, tile_b), jnp.float32),
        grid=(num_tiles,),
        in_specs=in_specs,
        out_specs=out_specs,
        compiler_params=pltpu.CompilerParams(
            dimension_semantics=("parallel",)),
        cost_estimate=cost,
    )(state, action,
      params["w1"], params["b1"],
      params["w2h"], params["w2a"], params["b2"],
      params["w3"], params["b3"],
      params["wo_row"], params["bo"])

    return out.reshape(b_pad, 1)[:B]


def init_params(key, input_dims, n_actions, fc1_dims=256, fc2_dims=256,
                fc3_dims=256, init_w=0.003):
    """Raw f32 parameters mirroring the PyTorch module's init (torch (out,in) layout)."""
    ks = jax.random.split(key, 8)

    def uniform(k, shape, bound):
        return jax.random.uniform(k, shape, jnp.float32, -bound, bound)

    # fanin_init in the source uses fanin = weight.size(0) = out_features.
    w1 = uniform(ks[0], (fc1_dims, input_dims), 1.0 / np.sqrt(fc1_dims))
    b1 = uniform(ks[1], (fc1_dims,), 1.0 / np.sqrt(input_dims))               # nn.Linear default
    w2 = uniform(ks[2], (fc2_dims, fc1_dims + n_actions), 1.0 / np.sqrt(fc2_dims))
    b2 = uniform(ks[3], (fc2_dims,), 1.0 / np.sqrt(fc1_dims + n_actions))
    w3 = uniform(ks[4], (fc3_dims, fc2_dims), init_w)
    b3 = uniform(ks[5], (fc3_dims,), 1.0 / np.sqrt(fc2_dims))
    wo = uniform(ks[6], (1, fc3_dims), 1.0 / np.sqrt(fc3_dims))
    bo = uniform(ks[7], (1,), 1.0 / np.sqrt(fc3_dims))
    g1 = jnp.ones((fc1_dims,), jnp.float32)    # LayerNorm defaults
    be1 = jnp.zeros((fc1_dims,), jnp.float32)
    return dict(w1=w1, b1=b1, w2=w2, b2=b2, w3=w3, b3=b3, wo=wo, bo=bo, g1=g1, be1=be1)


def prepare_kernel_params(raw, fc1_dims):
    """Transpose to (in, out), split W2 for the concat, fold LN affine into fc2, cast
    matmul operands to bf16 once (host-side, not per call)."""
    w2_t = raw["w2"].T                        # (fc1 + n_act, fc2)
    w2h = w2_t[:fc1_dims]
    w2a = w2_t[fc1_dims:]
    # (h*gamma + beta) @ W2h  ==  h @ (gamma[:,None] * W2h)  +  beta @ W2h
    w2h_folded = w2h * raw["g1"][:, None]
    b2_folded = raw["b2"] + raw["be1"] @ w2h
    return dict(
        w1=raw["w1"].T.astype(jnp.bfloat16),
        b1=raw["b1"].reshape(1, -1),
        w2h=w2h_folded.astype(jnp.bfloat16),
        w2a=w2a.astype(jnp.bfloat16),
        b2=b2_folded.reshape(1, -1),
        w3=raw["w3"].T.astype(jnp.bfloat16),
        b3=raw["b3"].reshape(1, -1),
        wo_row=raw["wo"].reshape(1, -1),
        bo=raw["bo"].reshape(1, 1),
    )


def reference_forward_bf16(state, action, kp):
    """Pure-JAX reference matching the kernel's precision policy exactly."""
    bf = jnp.bfloat16
    dot = functools.partial(jnp.dot, preferred_element_type=jnp.float32)
    h1 = jnp.maximum(dot(state.astype(bf), kp["w1"]) + kp["b1"], 0.0)
    mean = jnp.mean(h1, -1, keepdims=True)
    var = jnp.maximum(jnp.mean(h1 * h1, -1, keepdims=True) - mean * mean, 0.0)
    h1 = (h1 - mean) * jax.lax.rsqrt(var + 1e-5)
    h2 = jnp.maximum(dot(h1.astype(bf), kp["w2h"])
                     + dot(action.astype(bf), kp["w2a"]) + kp["b2"], 0.0)
    h3 = jnp.maximum(dot(h2.astype(bf), kp["w3"]) + kp["b3"], 0.0)
    return jnp.sum(h3 * kp["wo_row"], -1, keepdims=True) + kp["bo"]


def reference_forward_f32(state, action, raw):
    """Full-precision reference of the original PyTorch forward (with explicit concat)."""
    h1 = jnp.maximum(state @ raw["w1"].T + raw["b1"], 0.0)
    mean = jnp.mean(h1, -1, keepdims=True)
    var = jnp.mean((h1 - mean) ** 2, -1, keepdims=True)
    h1 = (h1 - mean) / jnp.sqrt(var + 1e-5) * raw["g1"] + raw["be1"]
    cat = jnp.concatenate([h1, action], axis=1)
    h2 = jnp.maximum(cat @ raw["w2"].T + raw["b2"], 0.0)
    h3 = jnp.maximum(h2 @ raw["w3"].T + raw["b3"], 0.0)
    return h3 @ raw["wo"].T + raw["bo"]


if __name__ == "__main__":
    B, input_dims, n_actions = 2, 32, 8
    key = jax.random.PRNGKey(0)
    k_state, k_action, k_params = jax.random.split(key, 3)

    state = jax.random.normal(k_state, (B, input_dims), jnp.float32)
    action = jax.random.normal(k_action, (B, n_actions), jnp.float32)

    raw = init_params(k_params, input_dims, n_actions)
    kparams = prepare_kernel_params(raw, fc1_dims=256)

    q = jax.block_until_ready(critic_forward(state, action, kparams))
    q_bf = np.asarray(reference_forward_bf16(state, action, kparams))
    q_f32 = np.asarray(reference_forward_f32(state, action, raw))

    assert q.shape == (B, 1)
    # Tight check vs. a pure-JAX reference using the same bf16-operand / f32-accumulate policy.
    assert np.allclose(np.asarray(q), q_bf, rtol=2e-3, atol=2e-3), (q, q_bf)
    # Loose sanity check vs. the full-f32 original-module math (bf16 operands ~1% rel error).
    assert np.allclose(np.asarray(q), q_f32, rtol=1e-1, atol=3e-2), (q, q_f32)
    print("KERNEL_OK")
</pallas_src>

<mosaic_0001>
module attributes {stable_mosaic.version = 11 : i64} {
  func.func @critic_kernel(%arg0: i32, %arg1: memref<8x32xf32, #tpu.memory_space<vmem>>, %arg2: memref<8x8xf32, #tpu.memory_space<vmem>>, %arg3: memref<32x256xbf16, #tpu.memory_space<vmem>>, %arg4: memref<1x256xf32, #tpu.memory_space<vmem>>, %arg5: memref<256x256xbf16, #tpu.memory_space<vmem>>, %arg6: memref<8x256xbf16, #tpu.memory_space<vmem>>, %arg7: memref<1x256xf32, #tpu.memory_space<vmem>>, %arg8: memref<256x256xbf16, #tpu.memory_space<vmem>>, %arg9: memref<1x256xf32, #tpu.memory_space<vmem>>, %arg10: memref<1x256xf32, #tpu.memory_space<vmem>>, %arg11: memref<1x1xf32, #tpu.memory_space<vmem>>, %arg12: memref<1x1x8xf32, #tpu.memory_space<vmem>>) attributes {dimension_semantics = [#tpu.dimension_semantics<parallel>], iteration_bounds = array<i64: 1>, scalar_prefetch = 0 : i64, scratch_operands = 0 : i64, tpu.core_type = #tpu.core_type<tc>, window_params = [{transform_indices = @transform_0, window_bounds = array<i64: 8, 32>}, {transform_indices = @transform_1, window_bounds = array<i64: 8, 8>}, {pipeline_mode = #tpu.pipeline_mode<synchronous>, transform_indices = @transform_2, window_bounds = array<i64: 32, 256>}, {pipeline_mode = #tpu.pipeline_mode<synchronous>, transform_indices = @transform_3, window_bounds = array<i64: 1, 256>}, {pipeline_mode = #tpu.pipeline_mode<synchronous>, transform_indices = @transform_4, window_bounds = array<i64: 256, 256>}, {pipeline_mode = #tpu.pipeline_mode<synchronous>, transform_indices = @transform_5, window_bounds = array<i64: 8, 256>}, {pipeline_mode = #tpu.pipeline_mode<synchronous>, transform_indices = @transform_6, window_bounds = array<i64: 1, 256>}, {pipeline_mode = #tpu.pipeline_mode<synchronous>, transform_indices = @transform_7, window_bounds = array<i64: 256, 256>}, {pipeline_mode = #tpu.pipeline_mode<synchronous>, transform_indices = @transform_8, window_bounds = array<i64: 1, 256>}, {pipeline_mode = #tpu.pipeline_mode<synchronous>, transform_indices = @transform_9, window_bounds = array<i64: 1, 256>}, {pipeline_mode = #tpu.pipeline_mode<synchronous>, transform_indices = @transform_10, window_bounds = array<i64: 1, 1>}, {transform_indices = @transform_11, window_bounds = array<i64: 1, 1, 8>}]} {
    %c0 = arith.constant 0 : index
    %c0_0 = arith.constant 0 : index
    %0 = vector.load %arg1[%c0, %c0_0] : memref<8x32xf32, #tpu.memory_space<vmem>>, vector<8x32xf32>
    %1 = arith.truncf %0 : vector<8x32xf32> to vector<8x32xbf16>
    %c0_1 = arith.constant 0 : index
    %c0_2 = arith.constant 0 : index
    %2 = vector.load %arg2[%c0_1, %c0_2] : memref<8x8xf32, #tpu.memory_space<vmem>>, vector<8x8xf32>
    %3 = arith.truncf %2 : vector<8x8xf32> to vector<8x8xbf16>
    %c0_3 = arith.constant 0 : index
    %c0_4 = arith.constant 0 : index
    %4 = vector.load %arg3[%c0_3, %c0_4] : memref<32x256xbf16, #tpu.memory_space<vmem>>, vector<32x256xbf16>
    %cst = arith.constant dense<0.000000e+00> : vector<8x256xf32>
    %5 = tpu.matmul %1, %4, %cst {dimension_numbers = #tpu.dot_dimension_numbers<[1], [0], [0], [1], [0, 0, 1, 1], [], []>} : vector<8x32xbf16>, vector<32x256xbf16>, vector<8x256xf32> -> vector<8x256xf32>
    %c0_5 = arith.constant 0 : index
    %c0_6 = arith.constant 0 : index
    %6 = vector.load %arg4[%c0_5, %c0_6] : memref<1x256xf32, #tpu.memory_space<vmem>>, vector<1x256xf32>
    %7 = vector.broadcast %6 : vector<1x256xf32> to vector<8x256xf32>
    %8 = arith.addf %5, %7 : vector<8x256xf32>
    %cst_7 = arith.constant 0.000000e+00 : f32
    %9 = vector.broadcast %cst_7 : f32 to vector<8x256xf32>
    %10 = arith.maximumf %8, %9 : vector<8x256xf32>
    %cst_8 = arith.constant dense<0.000000e+00> : vector<8xf32>
    %11 = vector.multi_reduction <add>, %10, %cst_8 [1] : vector<8x256xf32> to vector<8xf32>
    %12 = vector.shape_cast %11 : vector<8xf32> to vector<8x1xf32>
    %cst_9 = arith.constant 3.906250e-03 : f32
    %13 = vector.broadcast %cst_9 : f32 to vector<8x1xf32>
    %14 = arith.mulf %12, %13 : vector<8x1xf32>
    %15 = arith.mulf %10, %10 : vector<8x256xf32>
    %cst_10 = arith.constant dense<0.000000e+00> : vector<8xf32>
    %16 = vector.multi_reduction <add>, %15, %cst_10 [1] : vector<8x256xf32> to vector<8xf32>
    %17 = vector.shape_cast %16 : vector<8xf32> to vector<8x1xf32>
    %cst_11 = arith.constant 3.906250e-03 : f32
    %18 = vector.broadcast %cst_11 : f32 to vector<8x1xf32>
    %19 = arith.mulf %17, %18 : vector<8x1xf32>
    %20 = arith.mulf %14, %14 : vector<8x1xf32>
    %21 = arith.subf %19, %20 : vector<8x1xf32>
    %cst_12 = arith.constant 0.000000e+00 : f32
    %22 = vector.broadcast %cst_12 : f32 to vector<8x1xf32>
    %23 = arith.maximumf %21, %22 : vector<8x1xf32>
    %24 = vector.broadcast %14 : vector<8x1xf32> to vector<8x256xf32>
    %25 = arith.subf %10, %24 : vector<8x256xf32>
    %cst_13 = arith.constant 9.99999974E-6 : f32
    %26 = vector.broadcast %cst_13 : f32 to vector<8x1xf32>
    %27 = arith.addf %23, %26 : vector<8x1xf32>
    %28 = math.rsqrt %27 : vector<8x1xf32>
    %29 = vector.broadcast %28 : vector<8x1xf32> to vector<8x256xf32>
    %30 = arith.mulf %25, %29 : vector<8x256xf32>
    %31 = arith.truncf %30 : vector<8x256xf32> to vector<8x256xbf16>
    %c0_14 = arith.constant 0 : index
    %c0_15 = arith.constant 0 : index
    %32 = vector.load %arg5[%c0_14, %c0_15] : memref<256x256xbf16, #tpu.memory_space<vmem>>, vector<256x256xbf16>
    %cst_16 = arith.constant dense<0.000000e+00> : vector<8x256xf32>
    %33 = tpu.matmul %31, %32, %cst_16 {dimension_numbers = #tpu.dot_dimension_numbers<[1], [0], [0], [1], [0, 0, 1, 1], [], []>} : vector<8x256xbf16>, vector<256x256xbf16>, vector<8x256xf32> -> vector<8x256xf32>
    %c0_17 = arith.constant 0 : index
    %c0_18 = arith.constant 0 : index
    %34 = vector.load %arg6[%c0_17, %c0_18] : memref<8x256xbf16, #tpu.memory_space<vmem>>, vector<8x256xbf16>
    %cst_19 = arith.constant dense<0.000000e+00> : vector<8x256xf32>
    %35 = tpu.matmul %3, %34, %cst_19 {dimension_numbers = #tpu.dot_dimension_numbers<[1], [0], [0], [1], [0, 0, 1, 1], [], []>} : vector<8x8xbf16>, vector<8x256xbf16>, vector<8x256xf32> -> vector<8x256xf32>
    %36 = arith.addf %33, %35 : vector<8x256xf32>
    %c0_20 = arith.constant 0 : index
    %c0_21 = arith.constant 0 : index
    %37 = vector.load %arg7[%c0_20, %c0_21] : memref<1x256xf32, #tpu.memory_space<vmem>>, vector<1x256xf32>
    %38 = vector.broadcast %37 : vector<1x256xf32> to vector<8x256xf32>
    %39 = arith.addf %36, %38 : vector<8x256xf32>
    %cst_22 = arith.constant 0.000000e+00 : f32
    %40 = vector.broadcast %cst_22 : f32 to vector<8x256xf32>
    %41 = arith.maximumf %39, %40 : vector<8x256xf32>
    %42 = arith.truncf %41 : vector<8x256xf32> to vector<8x256xbf16>
    %c0_23 = arith.constant 0 : index
    %c0_24 = arith.constant 0 : index
    %43 = vector.load %arg8[%c0_23, %c0_24] : memref<256x256xbf16, #tpu.memory_space<vmem>>, vector<256x256xbf16>
    %cst_25 = arith.constant dense<0.000000e+00> : vector<8x256xf32>
    %44 = tpu.matmul %42, %43, %cst_25 {dimension_numbers = #tpu.dot_dimension_numbers<[1], [0], [0], [1], [0, 0, 1, 1], [], []>} : vector<8x256xbf16>, vector<256x256xbf16>, vector<8x256xf32> -> vector<8x256xf32>
    %c0_26 = arith.constant 0 : index
    %c0_27 = arith.constant 0 : index
    %45 = vector.load %arg9[%c0_26, %c0_27] : memref<1x256xf32, #tpu.memory_space<vmem>>, vector<1x256xf32>
    %46 = vector.broadcast %45 : vector<1x256xf32> to vector<8x256xf32>
    %47 = arith.addf %44, %46 : vector<8x256xf32>
    %cst_28 = arith.constant 0.000000e+00 : f32
    %48 = vector.broadcast %cst_28 : f32 to vector<8x256xf32>
    %49 = arith.maximumf %47, %48 : vector<8x256xf32>
    %c0_29 = arith.constant 0 : index
    %c0_30 = arith.constant 0 : index
    %50 = vector.load %arg10[%c0_29, %c0_30] : memref<1x256xf32, #tpu.memory_space<vmem>>, vector<1x256xf32>
    %51 = vector.broadcast %50 : vector<1x256xf32> to vector<8x256xf32>
    %52 = arith.mulf %49, %51 : vector<8x256xf32>
    %cst_31 = arith.constant dense<0.000000e+00> : vector<8xf32>
    %53 = vector.multi_reduction <add>, %52, %cst_31 [1] : vector<8x256xf32> to vector<8xf32>
    %54 = vector.shape_cast %53 : vector<8xf32> to vector<8x1xf32>
    %c0_32 = arith.constant 0 : index
    %c0_33 = arith.constant 0 : index
    %55 = vector.load %arg11[%c0_32, %c0_33] : memref<1x1xf32, #tpu.memory_space<vmem>>, vector<1x1xf32>
    %56 = vector.broadcast %55 : vector<1x1xf32> to vector<8x1xf32>
    %57 = arith.addf %54, %56 : vector<8x1xf32>
    %58 = tpu.transpose %57, [1, 0] : vector<8x1xf32> -> vector<1x8xf32>
    %59 = vector.shape_cast %58 : vector<1x8xf32> to vector<1x1x8xf32>
    %c0_34 = arith.constant 0 : index
    %c0_35 = arith.constant 0 : index
    %c0_36 = arith.constant 0 : index
    %60 = vector.load %arg12[%c0_34, %c0_35, %c0_36] : memref<1x1x8xf32, #tpu.memory_space<vmem>>, vector<1x1x8xf32>
    tpu.vector_store %arg12[%c0_34, %c0_35, %c0_36], %59 {strides = array<i32>} : memref<1x1x8xf32, #tpu.memory_space<vmem>>, vector<1x1x8xf32>,
    return
  }
  func.func @transform_0(%arg0: i32) -> (i32, i32) {
    %c0_i32 = arith.constant 0 : i32
    %c0_i32_0 = arith.constant 0 : i32
    return %arg0, %c0_i32 : i32, i32
  }
  func.func @transform_1(%arg0: i32) -> (i32, i32) {
    %c0_i32 = arith.constant 0 : i32
    %c0_i32_0 = arith.constant 0 : i32
    return %arg0, %c0_i32 : i32, i32
  }
  func.func @transform_2(%arg0: i32) -> (i32, i32) {
    %c0_i32 = arith.constant 0 : i32
    %c0_i32_0 = arith.constant 0 : i32
    %c0_i32_1 = arith.constant 0 : i32
    return %c0_i32, %c0_i32_0 : i32, i32
  }
  func.func @transform_3(%arg0: i32) -> (i32, i32) {
    %c0_i32 = arith.constant 0 : i32
    %c0_i32_0 = arith.constant 0 : i32
    %c0_i32_1 = arith.constant 0 : i32
    return %c0_i32, %c0_i32_0 : i32, i32
  }
  func.func @transform_4(%arg0: i32) -> (i32, i32) {
    %c0_i32 = arith.constant 0 : i32
    %c0_i32_0 = arith.constant 0 : i32
    %c0_i32_1 = arith.constant 0 : i32
    return %c0_i32, %c0_i32_0 : i32, i32
  }
  func.func @transform_5(%arg0: i32) -> (i32, i32) {
    %c0_i32 = arith.constant 0 : i32
    %c0_i32_0 = arith.constant 0 : i32
    %c0_i32_1 = arith.constant 0 : i32
    return %c0_i32, %c0_i32_0 : i32, i32
  }
  func.func @transform_6(%arg0: i32) -> (i32, i32) {
    %c0_i32 = arith.constant 0 : i32
    %c0_i32_0 = arith.constant 0 : i32
    %c0_i32_1 = arith.constant 0 : i32
    return %c0_i32, %c0_i32_0 : i32, i32
  }
  func.func @transform_7(%arg0: i32) -> (i32, i32) {
    %c0_i32 = arith.constant 0 : i32
    %c0_i32_0 = arith.constant 0 : i32
    %c0_i32_1 = arith.constant 0 : i32
    return %c0_i32, %c0_i32_0 : i32, i32
  }
  func.func @transform_8(%arg0: i32) -> (i32, i32) {
    %c0_i32 = arith.constant 0 : i32
    %c0_i32_0 = arith.constant 0 : i32
    %c0_i32_1 = arith.constant 0 : i32
    return %c0_i32, %c0_i32_0 : i32, i32
  }
  func.func @transform_9(%arg0: i32) -> (i32, i32) {
    %c0_i32 = arith.constant 0 : i32
    %c0_i32_0 = arith.constant 0 : i32
    %c0_i32_1 = arith.constant 0 : i32
    return %c0_i32, %c0_i32_0 : i32, i32
  }
  func.func @transform_10(%arg0: i32) -> (i32, i32) {
    %c0_i32 = arith.constant 0 : i32
    %c0_i32_0 = arith.constant 0 : i32
    %c0_i32_1 = arith.constant 0 : i32
    return %c0_i32, %c0_i32_0 : i32, i32
  }
  func.func @transform_11(%arg0: i32) -> (i32, i32, i32) {
    %c0_i32 = arith.constant 0 : i32
    %c0_i32_0 = arith.constant 0 : i32
    %c0_i32_1 = arith.constant 0 : i32
    return %arg0, %c0_i32, %c0_i32_0 : i32, i32, i32
  }
}

</mosaic_0001>

<bundles_post_ra>
// kernel: tpu_custom_call.1
= control target key start
LH: loop header
LB: loop body
LE: loop exit
PB: predicated region body
PF: predicated region fallthrough
CT: control target
= control target key end

     0   :  { %s1502_s0 = inlined_call_operand.hbm [shape: f32[8,32], index: 0, kind: input, shape index: {}]   ;;  %s1503_s1 = inlined_call_operand.hbm [shape: f32[8,8], index: 1, kind: input, shape index: {}]   ;;  %s1504_s2 = inlined_call_operand.hbm [shape: bf16[32,256], index: 2, kind: input, shape index: {}]   ;;  %s1505_s3 = inlined_call_operand.vmem [shape: f32[1,256], index: 3, kind: input, shape index: {}]   ;;  %s1506_s4 = inlined_call_operand.hbm [shape: bf16[256,256], index: 4, kind: input, shape index: {}]   ;;  %s1507_s5 = inlined_call_operand.hbm [shape: bf16[8,256], index: 5, kind: input, shape index: {}]   ;;  %s1508_s6 = inlined_call_operand.vmem [shape: f32[1,256], index: 6, kind: input, shape index: {}]   ;;  %s1509_s7 = inlined_call_operand.hbm [shape: bf16[256,256], index: 7, kind: input, shape index: {}]   ;;  %s1510_s8 = inlined_call_operand.vmem [shape: f32[1,256], index: 8, kind: input, shape index: {}]   ;;  %s1511_s9 = inlined_call_operand.vmem [shape: f32[1,256], index: 9, kind: input, shape index: {}]   ;;  %s1512_s10 = inlined_call_operand.<no memory space> [shape: f32[1,1], index: 10, kind: input, shape index: {}]   ;;  %s1513_s11 = inlined_call_operand.hbm [shape: f32[1,1,8], index: 11, kind: output, shape index: {}]  }
   0x1   :  { %v16_v0 = vstv %s1512_s10 }
   0x2   :  { %17 = vst [vmem:[#allocation2] sm:$0x1] %v16_v0 }
   0x3   :  { %18 = vsyncpa [#allocation4], 0 }
   0x4   :  { %19 = vsyncpa [#allocation7], 0 }
   0x5   :  { %20 = vsyncpa [#allocation10], 0 }
   0x6   :  { %21 = vsyncpa [#allocation13], 0  ;;  %s39_s21 = sshll.u32 %s1503_s1, 4  ;;  %s40_s21 = int_to_ptr.hbm [resolvable:$true] %s39_s21 }
   0x7   :  { %22 = vsyncpa [#allocation5], 0  ;;  %s1382_s22 = smov [#allocation6]   ;;  %s64_s26 = sshll.u32 %s1506_s4, 4  ;;  %s65_s26 = int_to_ptr.hbm [resolvable:$true] %s64_s26 }
   0x8   :  { %s41_s23 = sshll.u32 %s1382_s22, 4  ;;  %s1383_s10 = smov [#allocation9]   ;;  %s42_s23 = int_to_ptr.vmem [resolvable:$true] %s41_s23 }
   0x9   :  { %44 = dma.hbm_to_vmem [thread:$0]  %s40_s21, 128, %s42_s23, [#allocation7]  }
   0xa   :  { %s66_s27 = sshll.u32 %s1383_s10, 4  ;;  %s28_s30 = sshll.u32 %s1502_s0, 4  ;;  %s67_s27 = int_to_ptr.vmem [resolvable:$true] %s66_s27  ;;  %s29_s30 = int_to_ptr.hbm [resolvable:$true] %s28_s30 }
   0xb   :  { %s1384_s1 = smov 128   ;;  %s1385_s12 = smov 8  }
   0xc   :  { %72 = dma.hbm_to_vmem [thread:$0]  %s65_s26, 4096, %s67_s27, [#allocation10], %s1384_s1, %s1384_s1, %s1385_s12  }
   0xd   :  { %s49_s15 = sshll.u32 %s1504_s2, 4  ;;  %s1386_s16 = smov [#allocation3]   ;;  %s50_s15 = int_to_ptr.hbm [resolvable:$true] %s49_s15 }
   0xe   :  { %s30_s17 = sshll.u32 %s1386_s16, 4  ;;  %s1387_s4 = smov [#allocation8]   ;;  %s31_s17 = int_to_ptr.vmem [resolvable:$true] %s30_s17 }
   0xf   :  { %33 = dma.hbm_to_vmem [thread:$0]  %s29_s30, 128, %s31_s17, [#allocation4]  }
  0x10   :  { %s51_s18 = sshll.u32 %s1387_s4, 4  ;;  %s78_s0 = sshll.u32 %s1507_s5, 4  ;;  %s52_s18 = int_to_ptr.vmem [resolvable:$true] %s51_s18  ;;  %s79_s0 = int_to_ptr.hbm [resolvable:$true] %s78_s0 }
  0x11   :  { %57 = dma.hbm_to_vmem [thread:$0]  %s50_s15, 512, %s52_s18, [#allocation7], %s1384_s1, %s1384_s1, %s1385_s12  }
  0x12   :  { %s90_s23 = sshll.u32 %s1509_s7, 4  ;;  %s1388_s24 = smov [#allocation11]   ;;  %s91_s23 = int_to_ptr.hbm [resolvable:$true] %s90_s23 }
  0x13   :  { %s80_s2 = sshll.u32 %s1388_s24, 4  ;;  %s1389_s25 = smov [#allocation12]   ;;  %s81_s2 = int_to_ptr.vmem [resolvable:$true] %s80_s2 }
  0x14   :  { %83 = dma.hbm_to_vmem [thread:$0]  %s79_s0, 128, %s81_s2, [#allocation10]  }
  0x15   :  { %s92_s26 = sshll.u32 %s1389_s25, 4  ;;  %s93_s26 = int_to_ptr.vmem [resolvable:$true] %s92_s26 }
  0x16   :  { %98 = dma.hbm_to_vmem [thread:$0]  %s91_s23, 4096, %s93_s26, [#allocation13], %s1384_s1, %s1384_s1, %s1385_s12  }
  0x17   :  { %1372 = dma.done.wait [#allocation4], 128  }
  0x18   :  { %1373 = vsyncadd [#allocation4], 4294967168 }
  0x19   :  { %1374 = dma.done.wait [#allocation7], 640  }
  0x1a   :  { %1375 = vsyncadd [#allocation7], 4294966656 }
  0x1b   :  { %1376 = dma.done.wait [#allocation10], 4224  }
  0x1c   :  { %1377 = vsyncadd [#allocation10], 4294963072 }
  0x1d   :  { %1378 = dma.done.wait [#allocation13], 4096  }
  0x1e   :  { %1379 = vsyncadd [#allocation13], 4294963200  ;;  %v857_v1 = vld [vmem:[#allocation8 + $0x10] sm:$0xf]  ;;  %v1126_v2 = vld [vmem:[#allocation8 + $0x14] sm:$0xf0] }
  0x1f   :  { %v1125_v3 = vld [vmem:[#allocation8 + $0x14] sm:$0xf]  ;;  %v858_v4 = vor.u32 %v1126_v2, %v857_v1  ;;  %v859_v5 = vld [vmem:[#allocation8 + $0x18] sm:$0xf0]  ;;  %v849_v6 = vld [vmem:[#allocation8] sm:$0xf] }
  0x20   :  { %v1124_v7 = vld [vmem:[#allocation8 + $0x4] sm:$0xf0]  ;;  %v862_v8 = vor.u32 %v1125_v3, %v859_v5  ;;  %v1123_v9 = vld [vmem:[#allocation8 + $0x4] sm:$0xf]  ;;  %v851_v10 = vld [vmem:[#allocation8 + $0x8] sm:$0xf0] }
  0x21   :  { %174 = vmatpush.bf16.msra.mxu0 %v858_v4  ;;  %v850_v11 = vor.u32 %v1124_v7, %v849_v6  ;;  %v130_v12 = vld [vmem:[#allocation3] sm:$0xff]  ;;  %v854_v13 = vor.u32 %v1123_v9, %v851_v10  ;;  %vm164_vm0 = vcmask 261120   ;;  %v258_v30 = vld [vmem:[#allocation11] sm:$0xff]  ;;  %vm268_vm1 = vcmask 1043456   ;;  %v1142_v34 = vld [vmem:[#allocation9 + $0x74] sm:$0xf0] }
  0x22   :  { %187 = vmatpush.bf16.msra.mxu1 %v862_v8  ;;  %v131_v14 = vpack.c.bf16 %v130_v12, %v130_v12  ;;  %v138_v15 = vld [vmem:[%s1505_s3] sm:$0x3]  ;;  %v260_v31 = vunpack.c.l.b16 %v258_v30  ;;  %v261_v32 = vunpack.c.h.b16 %v258_v30  ;;  %v1158_v39 = vld [vmem:[#allocation9 + $0xf4] sm:$0xf0]  ;;  %v1141_v40 = vld [vmem:[#allocation9 + $0x74] sm:$0xf] }
  0x23   :  { %v140_v16 = vperm.slane %v138_v15, 0  ;;  %v141_v17 = vperm.slane %v138_v15, 1  ;;  %v925_v33 = vld [vmem:[#allocation9 + $0x70] sm:$0xf]  ;;  %v927_v42 = vld [vmem:[#allocation9 + $0x78] sm:$0xf0] }
  0x24   :  { %v262_v35 = vpack.c.b16 %v260_v31, %v260_v31  ;;  %v263_v36 = vpack.c.b16 %v261_v32, %v261_v32  ;;  %v926_v37 = vor.u32 %v1142_v34, %v925_v33  ;;  %v989_v38 = vld [vmem:[#allocation9 + $0xf0] sm:$0xf]  ;;  %v1157_v43 = vld [vmem:[#allocation9 + $0xf4] sm:$0xf]  ;;  %v991_v44 = vld [vmem:[#allocation9 + $0xf8] sm:$0xf0]  ;;  %v930_v47 = vor.u32 %v1141_v40, %v927_v42 }
  0x25   :  { %175 = vmatpush.bf16.msra.mxu0 %v850_v11  ;;  %v990_v41 = vor.u32 %v1158_v39, %v989_v38  ;;  %v994_v48 = vor.u32 %v1157_v43, %v991_v44  ;;  %v917_v49 = vld [vmem:[#allocation9 + $0x60] sm:$0xf]  ;;  %v1140_v50 = vld [vmem:[#allocation9 + $0x64] sm:$0xf0]  ;;  %v1139_v54 = vld [vmem:[#allocation9 + $0x64] sm:$0xf] }
  0x26   :  { %188 = vmatpush.bf16.msra.mxu1 %v854_v13  ;;  %v270_v45 = vsel %vm268_vm1, %v262_v35, 0  ;;  %v273_v46 = vsel %vm268_vm1, %v263_v36, 0  ;;  %v981_v51 = vld [vmem:[#allocation9 + $0xe0] sm:$0xf]  ;;  %v918_v52 = vor.u32 %v1140_v50, %v917_v49  ;;  %v1156_v53 = vld [vmem:[#allocation9 + $0xe4] sm:$0xf0] }
  0x27   :  { %282 = vmatpush.bf16.msra.mxu2 %v270_v45  ;;  %295 = vmatpush.bf16.msra.mxu3 %v273_v46  ;;  %v919_v55 = vld [vmem:[#allocation9 + $0x68] sm:$0xf0]  ;;  %v982_v56 = vor.u32 %v1156_v53, %v981_v51  ;;  %v1155_v58 = vld [vmem:[#allocation9 + $0xe4] sm:$0xf]  ;;  %v132_v61 = vld [vmem:[#allocation6] sm:$0xff]  ;;  %vm264_vm2 = vcmask 64512  }
  0x28   :  { %863 = vmatmul.msk.bf16.vlgmr.msra.gmra.mxu0 %vm164_vm0, %v131_v14  ;;  %v922_v57 = vor.u32 %v1139_v54, %v919_v55  ;;  %v983_v59 = vld [vmem:[#allocation9 + $0xe8] sm:$0xf0]  ;;  %v133_v62 = vpack.c.bf16 %v132_v61, %v132_v61  ;;  %v909_v63 = vld [vmem:[#allocation9 + $0x50] sm:$0xf]  ;;  %v1138_v0 = vld [vmem:[#allocation9 + $0x54] sm:$0xf0] }
  0x29   :  { %864 = vmatmul.msk.bf16.vlgmr.msra.gmra.mxu1 %vm164_vm0, %v131_v14  ;;  %487 = vmatpush.bf16.msrb.mxu0 %v930_v47  ;;  %v986_v60 = vor.u32 %v1155_v58, %v983_v59  ;;  %v973_v1 = vld [vmem:[#allocation9 + $0xd0] sm:$0xf]  ;;  %v910_v2 = vor.u32 %v1138_v0, %v909_v63  ;;  %v1154_v3 = vld [vmem:[#allocation9 + $0xd4] sm:$0xf0]  ;;  %v1137_v4 = vld [vmem:[#allocation9 + $0x54] sm:$0xf] }
  0x2a   :  { %500 = vmatpush.bf16.msrb.mxu1 %v994_v48  ;;  %865 = vmatmul.msk.bf16.vlgmr.msra.gmra.mxu2 %vm264_vm2, %v133_v62  ;;  %v974_v5 = vor.u32 %v1154_v3, %v973_v1  ;;  %v911_v6 = vld [vmem:[#allocation9 + $0x58] sm:$0xf0]  ;;  %v1153_v7 = vld [vmem:[#allocation9 + $0xd4] sm:$0xf]  ;;  %v901_v11 = vld [vmem:[#allocation9 + $0x40] sm:$0xf] }
  0x2b   :  { %461 = vmatpush.bf16.msrb.mxu2 %v926_v37  ;;  %474 = vmatpush.bf16.msrb.mxu3 %v990_v41  ;;  %v975_v8 = vld [vmem:[#allocation9 + $0xd8] sm:$0xf0]  ;;  %v914_v9 = vor.u32 %v1137_v4, %v911_v6  ;;  %v1136_v12 = vld [vmem:[#allocation9 + $0x44] sm:$0xf0]  ;;  %v965_v13 = vld [vmem:[#allocation9 + $0xc0] sm:$0xf] }
  0x2c   :  { %866 = vmatmul.msk.bf16.vlgmr.msra.gmra.mxu3 %vm264_vm2, %v133_v62  ;;  %v978_v10 = vor.u32 %v1153_v7, %v975_v8  ;;  %v902_v14 = vor.u32 %v1136_v12, %v901_v11  ;;  %v1152_v15 = vld [vmem:[#allocation9 + $0xc4] sm:$0xf0]  ;;  %v1133_v30 = vld [vmem:[#allocation9 + $0x34] sm:$0xf]  ;;  %v895_v31 = vld [vmem:[#allocation9 + $0x38] sm:$0xf0] }
  0x2d   :  { %488 = vmatpush.bf16.msrb.mxu0 %v922_v57  ;;  %v898_v33 = vor.u32 %v1133_v30, %v895_v31  ;;  %v1149_v34 = vld [vmem:[#allocation9 + $0xb4] sm:$0xf]  ;;  %v959_v35 = vld [vmem:[#allocation9 + $0xb8] sm:$0xf0]  ;;  %v885_v37 = vld [vmem:[#allocation9 + $0x20] sm:$0xf] }
  0x2e   :  { %501 = vmatpush.bf16.msrb.mxu1 %v986_v60  ;;  %v962_v36 = vor.u32 %v1149_v34, %v959_v35  ;;  %v1132_v38 = vld [vmem:[#allocation9 + $0x24] sm:$0xf0]  ;;  %v949_v39 = vld [vmem:[#allocation9 + $0xa0] sm:$0xf]  ;;  %v1131_v42 = vld [vmem:[#allocation9 + $0x24] sm:$0xf] }
  0x2f   :  { %462 = vmatpush.bf16.msrb.mxu2 %v918_v52  ;;  %475 = vmatpush.bf16.msrb.mxu3 %v982_v56  ;;  %v886_v40 = vor.u32 %v1132_v38, %v885_v37  ;;  %v1148_v41 = vld [vmem:[#allocation9 + $0xa4] sm:$0xf0]  ;;  %v887_v43 = vld [vmem:[#allocation9 + $0x28] sm:$0xf0]  ;;  %v1147_v46 = vld [vmem:[#allocation9 + $0xa4] sm:$0xf] }
  0x30   :  { %v950_v44 = vor.u32 %v1148_v41, %v949_v39  ;;  %v890_v45 = vor.u32 %v1131_v42, %v887_v43  ;;  %v951_v47 = vld [vmem:[#allocation9 + $0xa8] sm:$0xf0]  ;;  %v877_v49 = vld [vmem:[#allocation9 + $0x10] sm:$0xf]  ;;  %v1130_v50 = vld [vmem:[#allocation9 + $0x14] sm:$0xf0] }
  0x31   :  { %489 = vmatpush.bf16.msrb.mxu0 %v914_v9  ;;  %v954_v48 = vor.u32 %v1147_v46, %v951_v47  ;;  %v941_v51 = vld [vmem:[#allocation9 + $0x90] sm:$0xf]  ;;  %v878_v52 = vor.u32 %v1130_v50, %v877_v49  ;;  %v1146_v53 = vld [vmem:[#allocation9 + $0x94] sm:$0xf0]  ;;  %v1129_v54 = vld [vmem:[#allocation9 + $0x14] sm:$0xf] }
  0x32   :  { %502 = vmatpush.bf16.msrb.mxu1 %v978_v10  ;;  %v879_v55 = vld [vmem:[#allocation9 + $0x18] sm:$0xf0]  ;;  %v942_v56 = vor.u32 %v1146_v53, %v941_v51  ;;  %v1145_v58 = vld [vmem:[#allocation9 + $0x94] sm:$0xf]  ;;  %v869_v60 = vld [vmem:[#allocation9] sm:$0xf] }
  0x33   :  { %463 = vmatpush.bf16.msrb.mxu2 %v910_v2  ;;  %476 = vmatpush.bf16.msrb.mxu3 %v974_v5  ;;  %v882_v57 = vor.u32 %v1129_v54, %v879_v55  ;;  %v943_v59 = vld [vmem:[#allocation9 + $0x98] sm:$0xf0]  ;;  %v1128_v63 = vld [vmem:[#allocation9 + $0x4] sm:$0xf0]  ;;  %v933_v0 = vld [vmem:[#allocation9 + $0x80] sm:$0xf] }
  0x34   :  { %v946_v62 = vor.u32 %v1145_v58, %v943_v59  ;;  %v1144_v1 = vld [vmem:[#allocation9 + $0x84] sm:$0xf0]  ;;  %v870_v2 = vor.u32 %v1128_v63, %v869_v60  ;;  %v1127_v4 = vld [vmem:[#allocation9 + $0x4] sm:$0xf]  ;;  %v871_v5 = vld [vmem:[#allocation9 + $0x8] sm:$0xf0] }
  0x35   :  { %v934_v3 = vor.u32 %v1144_v1, %v933_v0  ;;  %v874_v6 = vor.u32 %v1127_v4, %v871_v5  ;;  %v1143_v7 = vld [vmem:[#allocation9 + $0x84] sm:$0xf]  ;;  %v935_v8 = vld [vmem:[#allocation9 + $0x88] sm:$0xf0]  ;;  %v1117_v12 = vld [vmem:[#allocation12 + $0xf0] sm:$0xf] }
  0x36   :  { %v938_v9 = vor.u32 %v1143_v7, %v935_v8  ;;  %v1109_v38 = vld [vmem:[#allocation12 + $0xe0] sm:$0xf]  ;;  %v1188_v39 = vld [vmem:[#allocation12 + $0xe4] sm:$0xf0]  ;;  %v1111_v42 = vld [vmem:[#allocation12 + $0xe8] sm:$0xf0] }
  0x37   :  { %464 = vmatpush.bf16.msrb.mxu2 %v902_v14  ;;  %v1189_v14 = vld [vmem:[#allocation12 + $0xf4] sm:$0xf]  ;;  %v1110_v41 = vor.u32 %v1188_v39, %v1109_v38  ;;  %v1053_v43 = vld [vmem:[#allocation12 + $0x70] sm:$0xf]  ;;  %v1055_v46 = vld [vmem:[#allocation12 + $0x78] sm:$0xf0] }
  0x38   :  { %v1101_v47 = vld [vmem:[#allocation12 + $0xd0] sm:$0xf]  ;;  %v1186_v49 = vld [vmem:[#allocation12 + $0xd4] sm:$0xf0]  ;;  %v1185_v50 = vld [vmem:[#allocation12 + $0xd4] sm:$0xf] }
  0x39   :  { %v1103_v51 = vld [vmem:[#allocation12 + $0xd8] sm:$0xf0]  ;;  %v1045_v54 = vld [vmem:[#allocation12 + $0x60] sm:$0xf]  ;;  %v1172_v55 = vld [vmem:[#allocation12 + $0x64] sm:$0xf0] }
  0x3a   :  { %v1106_v53 = vor.u32 %v1185_v50, %v1103_v51  ;;  %v1047_v58 = vld [vmem:[#allocation12 + $0x68] sm:$0xf0]  ;;  %v1093_v59 = vld [vmem:[#allocation12 + $0xc0] sm:$0xf]  ;;  %v1184_v60 = vld [vmem:[#allocation12 + $0xc4] sm:$0xf0] }
  0x3b   :  { %v1183_v63 = vld [vmem:[#allocation12 + $0xc4] sm:$0xf]  ;;  %v1095_v0 = vld [vmem:[#allocation12 + $0xc8] sm:$0xf0]  ;;  %v1037_v1 = vld [vmem:[#allocation12 + $0x50] sm:$0xf] }
  0x3c   :  { %v1169_v4 = vld [vmem:[#allocation12 + $0x54] sm:$0xf]  ;;  %v1039_v5 = vld [vmem:[#allocation12 + $0x58] sm:$0xf0]  ;;  %v1085_v8 = vld [vmem:[#allocation12 + $0xb0] sm:$0xf] }
  0x3d   :  { %v1042_v7 = vor.u32 %v1169_v4, %v1039_v5  ;;  %v1069_v38 = vld [vmem:[#allocation12 + $0x90] sm:$0xf]  ;;  %v1178_v39 = vld [vmem:[#allocation12 + $0x94] sm:$0xf0]  ;;  %v1175_v50 = vld [vmem:[#allocation12 + $0x84] sm:$0xf] }
  0x3e   :  { %s834_s12 = sshll.u32 %s1513_s11, 4  ;;  %vm825_vm6 = vcmask 57344   ;;  %s835_s12 = int_to_ptr.hbm [resolvable:$true] %s834_s12 }
  0xa5   :  { %v177_v18 = vpop.f32.mrf.mxu0 }
  0xa6   :  { %v178_v19 = vadd.f32 %v177_v18, %v140_v16  ;;  %v190_v20 = vpop.f32.mrf.mxu1  ;;  %v1135_v16 = vld [vmem:[#allocation9 + $0x44] sm:$0xf]  ;;  %v966_v18 = vor.u32 %v1152_v15, %v965_v13  ;;  %v1190_v13 = vld [vmem:[#allocation12 + $0xf4] sm:$0xf0] }
  0xa7   :  { %v191_v21 = vadd.f32 %v190_v20, %v141_v17  ;;  %v903_v17 = vld [vmem:[#allocation9 + $0x48] sm:$0xf0]  ;;  %v1151_v20 = vld [vmem:[#allocation9 + $0xc4] sm:$0xf] }
  0xa8   :  { %v1475_v22 = vmax.f32 %v178_v19, 0.0  ;;  %v906_v19 = vor.u32 %v1135_v16, %v903_v17  ;;  %477 = vmatpush.bf16.msrb.mxu3 %v966_v18  ;;  %v1118_v17 = vor.u32 %v1190_v13, %v1117_v12  ;;  %v1119_v18 = vld [vmem:[#allocation12 + $0xf8] sm:$0xf0]  ;;  %v1029_v13 = vld [vmem:[#allocation12 + $0x40] sm:$0xf] }
  0xa9   :  { %v1477_v23 = vmax.f32 %v191_v21, 0.0  ;;  %v967_v21 = vld [vmem:[#allocation9 + $0xc8] sm:$0xf0]  ;;  %v1087_v12 = vld [vmem:[#allocation12 + $0xb8] sm:$0xf0] }
  0xaa   :  { %v200_v27 = vmul.f32 %v1475_v22, %v1475_v22  ;;  %490 = vmatpush.bf16.msrb.mxu0 %v906_v19  ;;  %v1122_v19 = vor.u32 %v1189_v14, %v1119_v18  ;;  %v1168_v14 = vld [vmem:[#allocation12 + $0x44] sm:$0xf0] }
  0xab   :  { %v196_v24 = vadd.f32 %v1477_v23, %v1475_v22  ;;  %v201_v28 = vmul.f32 %v1477_v23, %v1477_v23  ;;  %v1030_v18 = vor.u32 %v1168_v14, %v1029_v13 }
  0xad   :  { %197 = vadd.xlane.f32.xlu0 %v196_v24  ;;  %v179_v25 = vpop.f32.mrf.mxu0  ;;  %v202_v29 = vadd.f32 %v201_v28, %v200_v27  ;;  %v970_v24 = vor.u32 %v1151_v20, %v967_v21  ;;  %v957_v27 = vld [vmem:[#allocation9 + $0xb0] sm:$0xf] }
  0xae   :  { %v192_v26 = vpop.f32.mrf.mxu1  ;;  %v893_v25 = vld [vmem:[#allocation9 + $0x30] sm:$0xf]  ;;  %491 = vmatpush.bf16.msrb.mxu0 %v898_v33 }
  0xaf   :  { %v1134_v26 = vld [vmem:[#allocation9 + $0x34] sm:$0xf0]  ;;  %503 = vmatpush.bf16.msrb.mxu1 %v970_v24 }
  0xb0   :  { %v894_v28 = vor.u32 %v1134_v26, %v893_v25 }
  0xb2   :  { %465 = vmatpush.bf16.msrb.mxu2 %v894_v28  ;;  %492 = vmatpush.bf16.msrb.mxu0 %v890_v45 }
  0xb3   :  { %504 = vmatpush.bf16.msrb.mxu1 %v962_v36 }
  0xb5   :  { %203 = vadd.xlane.f32.xlu0 %v202_v29  ;;  %v1150_v29 = vld [vmem:[#allocation9 + $0xb4] sm:$0xf0] }
  0xb6   :  { %v958_v32 = vor.u32 %v1150_v29, %v957_v27  ;;  %466 = vmatpush.bf16.msrb.mxu2 %v886_v40  ;;  %493 = vmatpush.bf16.msrb.mxu0 %v882_v57  ;;  %v1187_v40 = vld [vmem:[#allocation12 + $0xe4] sm:$0xf]  ;;  %v1046_v57 = vor.u32 %v1172_v55, %v1045_v54  ;;  %v1005_v54 = vld [vmem:[#allocation12 + $0x10] sm:$0xf]  ;;  %v1162_v55 = vld [vmem:[#allocation12 + $0x14] sm:$0xf0] }
  0xb7   :  { %505 = vmatpush.bf16.msrb.mxu1 %v954_v48 }
  0xb8   :  { %478 = vmatpush.bf16.msrb.mxu3 %v958_v32 }
  0xba   :  { %467 = vmatpush.bf16.msrb.mxu2 %v878_v52  ;;  %494 = vmatpush.bf16.msrb.mxu0 %v874_v6  ;;  %v1102_v52 = vor.u32 %v1186_v49, %v1101_v47  ;;  %v1176_v49 = vld [vmem:[#allocation12 + $0x84] sm:$0xf0] }
  0xbb   :  { %506 = vmatpush.bf16.msrb.mxu1 %v946_v62  ;;  %v1094_v62 = vor.u32 %v1184_v60, %v1093_v59  ;;  %v997_v60 = vld [vmem:[#allocation12] sm:$0xf] }
  0xbc   :  { %479 = vmatpush.bf16.msrb.mxu3 %v950_v44  ;;  %v1174_v44 = vld [vmem:[#allocation12 + $0x74] sm:$0xf0] }
  0xbd   :  { %v1054_v45 = vor.u32 %v1174_v44, %v1053_v43  ;;  %v1013_v44 = vld [vmem:[#allocation12 + $0x20] sm:$0xf] }
  0xbe   :  { %468 = vmatpush.bf16.msrb.mxu2 %v870_v2  ;;  %v1098_v2 = vor.u32 %v1183_v63, %v1095_v0  ;;  %v999_v0 = vld [vmem:[#allocation12 + $0x8] sm:$0xf0] }
  0xbf   :  { %507 = vmatpush.bf16.msrb.mxu1 %v938_v9  ;;  %v1182_v9 = vld [vmem:[#allocation12 + $0xb4] sm:$0xf0] }
  0xc0   :  { %480 = vmatpush.bf16.msrb.mxu3 %v942_v56  ;;  %v1171_v56 = vld [vmem:[#allocation12 + $0x64] sm:$0xf] }
  0xc2   :  { %723 = vmatpush.bf16.msra.mxu2 %v1054_v45 }
  0xc3   :  { %762 = vmatpush.bf16.msra.mxu1 %v1122_v19 }
  0xc4   :  { %481 = vmatpush.bf16.msrb.mxu3 %v934_v3  ;;  %v1170_v3 = vld [vmem:[#allocation12 + $0x54] sm:$0xf0] }
  0xc5   :  { %v1038_v6 = vor.u32 %v1170_v3, %v1037_v1 }
  0xc6   :  { %724 = vmatpush.bf16.msra.mxu2 %v1046_v57  ;;  %v1006_v57 = vor.u32 %v1162_v55, %v1005_v54 }
  0xc8   :  { %736 = vmatpush.bf16.msra.mxu3 %v1118_v17  ;;  %v1031_v17 = vld [vmem:[#allocation12 + $0x48] sm:$0xf0] }
  0xca   :  { %725 = vmatpush.bf16.msra.mxu2 %v1038_v6 }
  0xcc   :  { %737 = vmatpush.bf16.msra.mxu3 %v1110_v41  ;;  %v1070_v41 = vor.u32 %v1178_v39, %v1069_v38 }
  0xce   :  { %726 = vmatpush.bf16.msra.mxu2 %v1030_v18 }
  0xd0   :  { %738 = vmatpush.bf16.msra.mxu3 %v1102_v52  ;;  %v1063_v52 = vld [vmem:[#allocation12 + $0x88] sm:$0xf0] }
  0xd4   :  { %739 = vmatpush.bf16.msra.mxu3 %v1094_v62  ;;  %v1159_v62 = vld [vmem:[#allocation12 + $0x4] sm:$0xf] }
  0xd5   :  { %v1002_v1 = vor.u32 %v1159_v62, %v999_v0 }
 0x120   :  { %v198_v61 = vpop.xlane.xlu0 %197 }
 0x121   :  { %v199_v10 = vmul.f32 0.00390625, %v198_v61  ;;  %v1050_v61 = vor.u32 %v1171_v56, %v1047_v58  ;;  %v1161_v56 = vld [vmem:[#allocation12 + $0x14] sm:$0xf]  ;;  %v1007_v58 = vld [vmem:[#allocation12 + $0x18] sm:$0xf0] }
 0x122   :  { %v1010_v59 = vor.u32 %v1161_v56, %v1007_v58 }
 0x123   :  { %v206_v15 = vmul.f32 %v199_v10, %v199_v10  ;;  %v209_v31 = vsub.f32 %v1475_v22, %v199_v10  ;;  %v210_v32 = vsub.f32 %v1477_v23, %v199_v10  ;;  %v1114_v22 = vor.u32 %v1187_v40, %v1111_v42  ;;  %v1173_v23 = vld [vmem:[#allocation12 + $0x74] sm:$0xf]  ;;  %v1071_v42 = vld [vmem:[#allocation12 + $0x98] sm:$0xf0] }
 0x124   :  { %v1058_v48 = vor.u32 %v1173_v23, %v1055_v46  ;;  %v1181_v10 = vld [vmem:[#allocation12 + $0xb4] sm:$0xf]  ;;  %v1163_v23 = vld [vmem:[#allocation12 + $0x24] sm:$0xf]  ;;  %v1015_v46 = vld [vmem:[#allocation12 + $0x28] sm:$0xf0] }
 0x125   :  { %763 = vmatpush.bf16.msra.mxu1 %v1114_v22  ;;  %v1177_v40 = vld [vmem:[#allocation12 + $0x94] sm:$0xf]  ;;  %v1164_v22 = vld [vmem:[#allocation12 + $0x24] sm:$0xf0]  ;;  %v1018_v47 = vor.u32 %v1163_v23, %v1015_v46  ;;  %v1201_v46 = vld [vmem:[#allocation2] ss:$0 sm:$0xff] }
 0x126   :  { %749 = vmatpush.bf16.msra.mxu0 %v1058_v48  ;;  %v1074_v43 = vor.u32 %v1177_v40, %v1071_v42  ;;  %v1014_v45 = vor.u32 %v1164_v22, %v1013_v44  ;;  %v1061_v48 = vld [vmem:[#allocation12 + $0x80] sm:$0xf] }
 0x127   :  { %v1062_v51 = vor.u32 %v1176_v49, %v1061_v48 }
 0x128   :  { %v204_v11 = vpop.xlane.xlu0 %203 }
 0x129   :  { %v205_v16 = vmul.f32 0.00390625, %v204_v11  ;;  %764 = vmatpush.bf16.msra.mxu1 %v1106_v53  ;;  %v1086_v11 = vor.u32 %v1182_v9, %v1085_v8  ;;  %v1066_v53 = vor.u32 %v1175_v50, %v1063_v52 }
 0x12a   :  { %750 = vmatpush.bf16.msra.mxu0 %v1050_v61  ;;  %v1160_v61 = vld [vmem:[#allocation12 + $0x4] sm:$0xf0] }
 0x12b   :  { %v207_v20 = vsub.f32 %v205_v16, %v206_v15  ;;  %v1090_v15 = vor.u32 %v1181_v10, %v1087_v12  ;;  %v1167_v16 = vld [vmem:[#allocation12 + $0x44] sm:$0xf]  ;;  %740 = vmatpush.bf16.msra.mxu3 %v1086_v11  ;;  %v998_v63 = vor.u32 %v1160_v61, %v997_v60 }
 0x12c   :  { %v1034_v19 = vor.u32 %v1167_v16, %v1031_v17 }
 0x12d   :  { %v208_v21 = vmax.f32 %v207_v20, 0.0  ;;  %765 = vmatpush.bf16.msra.mxu1 %v1098_v2  ;;  %v1487_v20 = vpop.f32.mrf.mxu2  ;;  %v513_v2 = vld [vmem:[%s1508_s6] sm:$0x3] }
 0x12e   :  { %751 = vmatpush.bf16.msra.mxu0 %v1042_v7  ;;  %v516_v6 = vperm.slane %v513_v2, 1  ;;  %v515_v12 = vperm.slane %v513_v2, 0 }
 0x12f   :  { %v211_v24 = vadd.f32 1e-05, %v208_v21  ;;  %v297_v21 = vpop.f32.mrf.mxu3 }
 0x131   :  { %1202 = vrsqrt.f32 %v211_v24  ;;  %vm218_vm4 = vweird.f32 %v211_v24  ;;  %766 = vmatpush.bf16.msra.mxu1 %v1090_v15 }
 0x132   :  { %752 = vmatpush.bf16.msra.mxu0 %v1034_v19 }
 0x137   :  { %v1203_v25 = vpop.eup %1202 }
 0x138   :  { %v213_v26 = vmul.f32 %v1203_v25, %v211_v24  ;;  %vm219_vm3 = vweird.f32 %v1203_v25  ;;  %v286_v24 = vpop.f32.mrf.mxu2 }
 0x139   :  { %vm220_vm5 = vmor %vm218_vm4, %vm219_vm3 }
 0x13a   :  { %v214_v27 = vmul.f32 %v1203_v25, %v213_v26  ;;  %v1077_v26 = vld [vmem:[#allocation12 + $0xa0] sm:$0xf] }
 0x13c   :  { %v215_v28 = vmul.f32 0.5, %v214_v27  ;;  %v1180_v27 = vld [vmem:[#allocation12 + $0xa4] sm:$0xf0] }
 0x13e   :  { %v216_v29 = vsub.f32 1.5, %v215_v28  ;;  %v1179_v28 = vld [vmem:[#allocation12 + $0xa4] sm:$0xf] }
 0x140   :  { %v217_v30 = vmul.f32 %v1203_v25, %v216_v29  ;;  %v1078_v29 = vor.u32 %v1180_v27, %v1077_v26  ;;  %v557_v26 = vld [vmem:[%s1510_s8] sm:$0x3]  ;;  %s1390_s8 = smov [#allocation14]  }
 0x141   :  { %v560_v27 = vperm.slane %v557_v26, 1  ;;  %s832_s30 = sshll.u32 %s1390_s8, 4  ;;  %s833_s30 = int_to_ptr.vmem [resolvable:$true] %s832_s30 }
 0x142   :  { %v221_v33 = vsel %vm220_vm5, %v1203_v25, %v217_v30  ;;  %v299_v25 = vpop.f32.mrf.mxu3  ;;  %v1079_v30 = vld [vmem:[#allocation12 + $0xa8] sm:$0xf0]  ;;  %741 = vmatpush.bf16.msra.mxu3 %v1078_v29 }
 0x143   :  { %v222_v34 = vmul.f32 %v221_v33, %v209_v31  ;;  %v223_v35 = vmul.f32 %v221_v33, %v210_v32  ;;  %v1082_v31 = vor.u32 %v1179_v28, %v1079_v30  ;;  %v1021_v32 = vld [vmem:[#allocation12 + $0x30] sm:$0xf]  ;;  %v1166_v33 = vld [vmem:[#allocation12 + $0x34] sm:$0xf0] }
 0x145   :  { %v224_v36 = vpack.c.bf16 %v222_v34, %v222_v34  ;;  %v225_v37 = vpack.c.bf16 %v223_v35, %v223_v35  ;;  %v1165_v34 = vld [vmem:[#allocation12 + $0x34] sm:$0xf]  ;;  %v1022_v35 = vor.u32 %v1166_v33, %v1021_v32  ;;  %767 = vmatpush.bf16.msra.mxu1 %v1082_v31  ;;  %v559_v32 = vperm.slane %v557_v26, 0 }
 0x146   :  { %742 = vmatpush.bf16.msra.mxu3 %v1070_v41 }
 0x147   :  { %469 = vmatmul.bf16.vlgmr.msrb.gmra.mxu2 %v224_v36  ;;  %482 = vmatmul.bf16.vlgmr.msrb.gmra.mxu3 %v225_v37 }
 0x148   :  { %495 = vmatmul.bf16.vlgmr.msrb.gmra.mxu0 %v224_v36  ;;  %508 = vmatmul.bf16.vlgmr.msrb.gmra.mxu1 %v225_v37  ;;  %v1023_v36 = vld [vmem:[#allocation12 + $0x38] sm:$0xf0] }
 0x149   :  { %v1026_v37 = vor.u32 %v1165_v34, %v1023_v36  ;;  %727 = vmatpush.bf16.msra.mxu2 %v1022_v35  ;;  %768 = vmatpush.bf16.msra.mxu1 %v1074_v43  ;;  %v777_v35 = vld [vmem:[%s1511_s9] sm:$0x3] }
 0x14a   :  { %743 = vmatpush.bf16.msra.mxu3 %v1062_v51  ;;  %v779_v41 = vperm.slane %v777_v35, 0  ;;  %v780_v42 = vperm.slane %v777_v35, 1 }
 0x14b   :  { %753 = vmatpush.bf16.msra.mxu0 %v1026_v37 }
 0x14d   :  { %728 = vmatpush.bf16.msra.mxu2 %v1014_v45  ;;  %769 = vmatpush.bf16.msra.mxu1 %v1066_v53 }
 0x14f   :  { %754 = vmatpush.bf16.msra.mxu0 %v1018_v47 }
 0x151   :  { %729 = vmatpush.bf16.msra.mxu2 %v1006_v57 }
 0x153   :  { %755 = vmatpush.bf16.msra.mxu0 %v1010_v59 }
 0x155   :  { %730 = vmatpush.bf16.msra.mxu2 %v998_v63 }
 0x157   :  { %756 = vmatpush.bf16.msra.mxu0 %v1002_v1 }
 0x1c5   :  { %v496_v3 = vpop.f32.mrf.mxu0  ;;  %v509_v4 = vpop.f32.mrf.mxu1 }
 0x1c6   :  { %v497_v5 = vadd.f32 %v496_v3, %v297_v21 }
 0x1c8   :  { %v510_v7 = vadd.f32 %v509_v4, %v497_v5 }
 0x1ca   :  { %v520_v8 = vadd.f32 %v516_v6, %v510_v7  ;;  %v470_v9 = vpop.f32.mrf.mxu2  ;;  %v483_v10 = vpop.f32.mrf.mxu3 }
 0x1cb   :  { %v471_v11 = vadd.f32 %v470_v9, %v1487_v20 }
 0x1cc   :  { %v522_v13 = vmax.f32 %v520_v8, 0.0 }
 0x1cd   :  { %v484_v14 = vadd.f32 %v483_v10, %v471_v11  ;;  %v498_v15 = vpop.f32.mrf.mxu0  ;;  %v511_v16 = vpop.f32.mrf.mxu1 }
 0x1ce   :  { %v524_v17 = vpack.c.bf16 %v522_v13, %v522_v13 }
 0x1cf   :  { %v519_v18 = vadd.f32 %v515_v12, %v484_v14 }
 0x1d0   :  { %744 = vmatmul.bf16.vlgmr.msra.gmra.mxu3 %v524_v17  ;;  %770 = vmatmul.bf16.vlgmr.msra.gmra.mxu1 %v524_v17 }
 0x1d1   :  { %v521_v19 = vmax.f32 %v519_v18, 0.0 }
 0x1d2   :  { %v472_v24 = vpop.f32.mrf.mxu2  ;;  %v485_v25 = vpop.f32.mrf.mxu3 }
 0x1d3   :  { %v523_v21 = vpack.c.bf16 %v521_v19, %v521_v19 }
 0x1d5   :  { %731 = vmatmul.bf16.vlgmr.msra.gmra.mxu2 %v523_v21  ;;  %757 = vmatmul.bf16.vlgmr.msra.gmra.mxu0 %v523_v21 }
 0x24d   :  { %v771_v20 = vpop.f32.mrf.mxu1 }
 0x252   :  { %v758_v28 = vpop.f32.mrf.mxu0 }
 0x253   :  { %v745_v29 = vpop.f32.mrf.mxu3  ;;  %v759_v30 = vadd.f32 %v758_v28, %v560_v27 }
 0x255   :  { %v773_v31 = vpop.f32.mrf.mxu1  ;;  %v772_v33 = vadd.f32 %v771_v20, %v759_v30 }
 0x257   :  { %v776_v38 = vmax.f32 %v772_v33, 0.0 }
 0x258   :  { %v732_v34 = vpop.f32.mrf.mxu2 }
 0x259   :  { %v733_v36 = vadd.f32 %v732_v34, %v559_v32  ;;  %v784_v22 = vmul.f32 %v780_v42, %v776_v38 }
 0x25a   :  { %v760_v37 = vpop.f32.mrf.mxu0 }
 0x25b   :  { %v746_v39 = vadd.f32 %v745_v29, %v733_v36  ;;  %v747_v40 = vpop.f32.mrf.mxu3 }
 0x25d   :  { %v775_v43 = vmax.f32 %v746_v39, 0.0 }
 0x25f   :  { %v783_v44 = vmul.f32 %v779_v41, %v775_v43 }
 0x260   :  { %v734_v45 = vpop.f32.mrf.mxu2 }
 0x261   :  { %v785_v23 = vadd.f32 %v784_v22, %v783_v44 }
 0x263   :  { %786 = vadd.xlane.f32.xlu1 %v785_v23 }
 0x2d6   :  { %v787_v47 = vpop.xlane.xlu1 %786 }
 0x2d7   :  { %v792_v48 = vadd.f32 %v1201_v46, %v787_v47 }
 0x2d9   :  { %793 = vxpose.xlu1.b32.start.end [1/1] (short) (narrow) %v792_v48, 8 }
 0x37d   :  { %v809_v49 = vpop.trf.xlu1 }
 0x37e   :  { %826 = vst.msk [vmem:[#allocation14] sm:$0x1] %vm825_vm6, %v809_v49 }
 0x37f   :  { %837 = dma.vmem_to_hbm [thread:$0]  %s833_s30, 16, %s835_s12, [#allocation5]  }
 0x380   :  { %1380 = dma.done.wait [#allocation5], 16  }
 0x381   :  { %1381 = vsyncadd [#allocation5], 4294967280 }
 0x382   :  { %842 = vsyncpa [#allocation4], 1 }
 0x383   :  { %843 = vsyncpa [#allocation7], 1 }
 0x384   :  { %844 = vsyncpa [#allocation10], 1 }
 0x385   :  { %845 = vsyncpa [#allocation13], 1 }
 0x386   :  { %846 = vsyncpa [#allocation5], 1 }

</bundles_post_ra>
